<compile_context>
chip_gen: v5e
topology: v5e:2x2
jax: 0.10.0
libtpu: 0.0.40
codegen_flags: <defaults>
</compile_context>

<pallas_src>
import functools

import jax
import jax.numpy as jnp
from jax.experimental import pallas as pl
from jax.experimental.pallas import tpu as pltpu

MAX_TILE_B = 2048   # batch-tile upper bound (multiple of 8; big tiles amortize
                    # per-step overhead and make output DMAs large & efficient)


def _round_up(x, m):
    return ((x + m - 1) // m) * m


def _decoder_kernel(x_ref, w1_ref, b1_ref, w2_ref, b2_ref, out_ref):
    f32 = jnp.float32
    # bf16 operands into the MXU, f32 accumulation; elementwise math in f32.
    x = x_ref[...].astype(jnp.bfloat16)
    h = jnp.dot(x, w1_ref[...], preferred_element_type=f32) + b1_ref[...]
    h = jnp.maximum(h, 0.0)                                   # F.relu(linear1(x))
    y = jnp.dot(h.astype(jnp.bfloat16), w2_ref[...],
                preferred_element_type=f32) + b2_ref[...]
    out_ref[...] = jnp.tanh(y).astype(out_ref.dtype)          # F.tanh(linear2(.))


def prepare_params(params):
    """One-time parameter prep: cast to kernel dtypes and pad the output
    (N) dimension of W2/b2 to a multiple of 128 so stores are lane-dense."""
    w1 = params["w1"].astype(jnp.bfloat16)
    b1 = params["b1"].reshape(1, -1).astype(jnp.float32)
    w2 = params["w2"]
    b2 = params["b2"].reshape(1, -1)
    d_out = w2.shape[1]
    d_out_p = _round_up(d_out, 128)
    if d_out_p != d_out:
        pad = d_out_p - d_out
        w2 = jnp.pad(w2, ((0, 0), (0, pad)))
        b2 = jnp.pad(b2, ((0, 0), (0, pad)))
    return dict(
        w1=w1, b1=b1,
        w2=w2.astype(jnp.bfloat16), b2=b2.astype(jnp.float32),
        d_out=d_out,
    )


def decoder_forward(x, prepped, *, max_tile_b=MAX_TILE_B, out_dtype=jnp.float32):
    """x: [B, D_in] f32 -> [B, D_out] (out_dtype), matching Decoder.forward."""
    B, d_in = x.shape
    h = prepped["w1"].shape[1]
    d_out = prepped["d_out"]
    d_out_p = prepped["w2"].shape[1]

    # Large tile for DMA/overhead efficiency, but keep the grid >= 2 steps when
    # B allows it so v7x's two TensorCores both get work.
    tb = min(max_tile_b, max(8, _round_up(pl.cdiv(B, 2), 8)))
    b_pad = _round_up(B, tb)
    x_p = jnp.pad(x, ((0, b_pad - B), (0, 0))) if b_pad != B else x
    grid = (b_pad // tb,)

    out_bytes = b_pad * d_out_p * jnp.dtype(out_dtype).itemsize
    cost = pl.CostEstimate(
        flops=2 * b_pad * (d_in * h + h * d_out_p),
        transcendentals=b_pad * d_out_p,
        bytes_accessed=(x_p.size * 4
                        + prepped["w1"].size * 2 + prepped["w2"].size * 2
                        + (prepped["b1"].size + prepped["b2"].size) * 4
                        + out_bytes),
    )

    out = pl.pallas_call(
        _decoder_kernel,
        out_shape=jax.ShapeDtypeStruct((b_pad, d_out_p), out_dtype),
        grid=grid,
        in_specs=[
            pl.BlockSpec((tb, d_in), lambda i: (i, 0)),      # x: pipelined over batch
            pl.BlockSpec((d_in, h), lambda i: (0, 0)),       # W1: VMEM-resident
            pl.BlockSpec((1, h), lambda i: (0, 0)),          # b1
            pl.BlockSpec((h, d_out_p), lambda i: (0, 0)),    # W2 (lane-padded)
            pl.BlockSpec((1, d_out_p), lambda i: (0, 0)),    # b2 (lane-padded)
        ],
        # NOTE: could sweep pipeline_mode=pl.Buffered(3) here once tiles are
        # large; left at the default depth for maximum portability.
        out_specs=pl.BlockSpec((tb, d_out_p), lambda i: (i, 0)),
        compiler_params=pltpu.CompilerParams(
            dimension_semantics=("parallel",),
            vmem_limit_bytes=32 * 1024 * 1024,
        ),
        cost_estimate=cost,
    )(x_p, prepped["w1"], prepped["b1"], prepped["w2"], prepped["b2"])

    return out[:B, :d_out]


def _linear_init(key, fan_in, fan_out):
    """PyTorch nn.Linear default init: U(-1/sqrt(fan_in), 1/sqrt(fan_in))."""
    kw, kb = jax.random.split(key)
    bound = 1.0 / jnp.sqrt(float(fan_in))
    w = jax.random.uniform(kw, (fan_in, fan_out), jnp.float32, -bound, bound)
    b = jax.random.uniform(kb, (1, fan_out), jnp.float32, -bound, bound)
    return w, b


def init_params(key, d_in, h, d_out):
    k1, k2 = jax.random.split(key)
    w1, b1 = _linear_init(k1, d_in, h)       # Decoder.linear1
    w2, b2 = _linear_init(k2, h, d_out)      # Decoder.linear2
    return dict(w1=w1, b1=b1, w2=w2, b2=b2)


if __name__ == "__main__":
    key = jax.random.PRNGKey(0)
    k_params, k_x = jax.random.split(key)

    D_IN, H, D_OUT = 8, 128, 784              # real MNIST decoder output width
    B = 256                                    # small batch; still a 2-step grid

    params = init_params(k_params, D_IN, H, D_OUT)
    prepped = prepare_params(params)          # casts/padding done once, not per call
    x = jax.random.normal(k_x, (B, D_IN), jnp.float32)

    fwd = jax.jit(functools.partial(decoder_forward, prepped=prepped))
    out = fwd(x)
    jax.block_until_ready(out)

    # Pure-JAX f32 reference; bf16 matmul operands give only small differences.
    ref = jnp.tanh(
        jnp.maximum(x @ params["w1"] + params["b1"], 0.0) @ params["w2"]
        + params["b2"])
    assert out.shape == (B, D_OUT)
    max_err = float(jnp.max(jnp.abs(out - ref)))
    assert max_err < 5e-2, f"mismatch vs reference: {max_err}"
    print("KERNEL_OK")
</pallas_src>

<mosaic_0001>
module attributes {stable_mosaic.version = 11 : i64} {
  func.func @_decoder_kernel(%arg0: i32, %arg1: memref<128x8xf32, #tpu.memory_space<vmem>>, %arg2: memref<8x128xbf16, #tpu.memory_space<vmem>>, %arg3: memref<1x128xf32, #tpu.memory_space<vmem>>, %arg4: memref<128x896xbf16, #tpu.memory_space<vmem>>, %arg5: memref<1x896xf32, #tpu.memory_space<vmem>>, %arg6: memref<128x896xf32, #tpu.memory_space<vmem>>) attributes {dimension_semantics = [#tpu.dimension_semantics<parallel>], iteration_bounds = array<i64: 2>, scalar_prefetch = 0 : i64, scratch_operands = 0 : i64, tpu.core_type = #tpu.core_type<tc>, window_params = [{transform_indices = @transform_0, window_bounds = array<i64: 128, 8>}, {pipeline_mode = #tpu.pipeline_mode<synchronous>, transform_indices = @transform_1, window_bounds = array<i64: 8, 128>}, {pipeline_mode = #tpu.pipeline_mode<synchronous>, transform_indices = @transform_2, window_bounds = array<i64: 1, 128>}, {pipeline_mode = #tpu.pipeline_mode<synchronous>, transform_indices = @transform_3, window_bounds = array<i64: 128, 896>}, {pipeline_mode = #tpu.pipeline_mode<synchronous>, transform_indices = @transform_4, window_bounds = array<i64: 1, 896>}, {transform_indices = @transform_5, window_bounds = array<i64: 128, 896>}]} {
    %c0 = arith.constant 0 : index
    %c0_0 = arith.constant 0 : index
    %0 = vector.load %arg1[%c0, %c0_0] : memref<128x8xf32, #tpu.memory_space<vmem>>, vector<128x8xf32>
    %1 = arith.truncf %0 : vector<128x8xf32> to vector<128x8xbf16>
    %c0_1 = arith.constant 0 : index
    %c0_2 = arith.constant 0 : index
    %2 = vector.load %arg2[%c0_1, %c0_2] : memref<8x128xbf16, #tpu.memory_space<vmem>>, vector<8x128xbf16>
    %cst = arith.constant dense<0.000000e+00> : vector<128x128xf32>
    %3 = tpu.matmul %1, %2, %cst {dimension_numbers = #tpu.dot_dimension_numbers<[1], [0], [0], [1], [0, 0, 1, 1], [], []>} : vector<128x8xbf16>, vector<8x128xbf16>, vector<128x128xf32> -> vector<128x128xf32>
    %c0_3 = arith.constant 0 : index
    %c0_4 = arith.constant 0 : index
    %4 = vector.load %arg3[%c0_3, %c0_4] : memref<1x128xf32, #tpu.memory_space<vmem>>, vector<1x128xf32>
    %5 = vector.broadcast %4 : vector<1x128xf32> to vector<128x128xf32>
    %6 = arith.addf %3, %5 : vector<128x128xf32>
    %cst_5 = arith.constant 0.000000e+00 : f32
    %7 = vector.broadcast %cst_5 : f32 to vector<128x128xf32>
    %8 = arith.maximumf %6, %7 : vector<128x128xf32>
    %9 = arith.truncf %8 : vector<128x128xf32> to vector<128x128xbf16>
    %c0_6 = arith.constant 0 : index
    %c0_7 = arith.constant 0 : index
    %10 = vector.load %arg4[%c0_6, %c0_7] : memref<128x896xbf16, #tpu.memory_space<vmem>>, vector<128x896xbf16>
    %cst_8 = arith.constant dense<0.000000e+00> : vector<128x896xf32>
    %11 = tpu.matmul %9, %10, %cst_8 {dimension_numbers = #tpu.dot_dimension_numbers<[1], [0], [0], [1], [0, 0, 1, 1], [], []>} : vector<128x128xbf16>, vector<128x896xbf16>, vector<128x896xf32> -> vector<128x896xf32>
    %c0_9 = arith.constant 0 : index
    %c0_10 = arith.constant 0 : index
    %12 = vector.load %arg5[%c0_9, %c0_10] : memref<1x896xf32, #tpu.memory_space<vmem>>, vector<1x896xf32>
    %13 = vector.broadcast %12 : vector<1x896xf32> to vector<128x896xf32>
    %14 = arith.addf %11, %13 : vector<128x896xf32>
    %15 = math.tanh %14 : vector<128x896xf32>
    %c0_11 = arith.constant 0 : index
    %c0_12 = arith.constant 0 : index
    %16 = vector.load %arg6[%c0_11, %c0_12] : memref<128x896xf32, #tpu.memory_space<vmem>>, vector<128x896xf32>
    tpu.vector_store %arg6[%c0_11, %c0_12], %15 {strides = array<i32>} : memref<128x896xf32, #tpu.memory_space<vmem>>, vector<128x896xf32>,
    return
  }
  func.func @transform_0(%arg0: i32) -> (i32, i32) {
    %c0_i32 = arith.constant 0 : i32
    %c0_i32_0 = arith.constant 0 : i32
    return %arg0, %c0_i32 : i32, i32
  }
  func.func @transform_1(%arg0: i32) -> (i32, i32) {
    %c0_i32 = arith.constant 0 : i32
    %c0_i32_0 = arith.constant 0 : i32
    %c0_i32_1 = arith.constant 0 : i32
    return %c0_i32, %c0_i32_0 : i32, i32
  }
  func.func @transform_2(%arg0: i32) -> (i32, i32) {
    %c0_i32 = arith.constant 0 : i32
    %c0_i32_0 = arith.constant 0 : i32
    %c0_i32_1 = arith.constant 0 : i32
    return %c0_i32, %c0_i32_0 : i32, i32
  }
  func.func @transform_3(%arg0: i32) -> (i32, i32) {
    %c0_i32 = arith.constant 0 : i32
    %c0_i32_0 = arith.constant 0 : i32
    %c0_i32_1 = arith.constant 0 : i32
    return %c0_i32, %c0_i32_0 : i32, i32
  }
  func.func @transform_4(%arg0: i32) -> (i32, i32) {
    %c0_i32 = arith.constant 0 : i32
    %c0_i32_0 = arith.constant 0 : i32
    %c0_i32_1 = arith.constant 0 : i32
    return %c0_i32, %c0_i32_0 : i32, i32
  }
  func.func @transform_5(%arg0: i32) -> (i32, i32) {
    %c0_i32 = arith.constant 0 : i32
    %c0_i32_0 = arith.constant 0 : i32
    return %arg0, %c0_i32 : i32, i32
  }
}

</mosaic_0001>

<bundles_post_ra>
// kernel: decoder_forward.1
= control target key start
LH: loop header
LB: loop body
LE: loop exit
PB: predicated region body
PF: predicated region fallthrough
CT: control target
= control target key end

     0   :  { %10 = vsyncpa [#allocation3], 0  ;;  %s2007_s18 = smov 0   ;;  %s2405_s0 = inlined_call_operand.vmem [shape: f32[256,8], index: 0, kind: input, shape index: {}]   ;;  %s2406_s1 = inlined_call_operand.vmem [shape: bf16[8,128], index: 1, kind: input, shape index: {}]   ;;  %s2407_s2 = inlined_call_operand.vmem [shape: f32[1,128], index: 2, kind: input, shape index: {}]   ;;  %s2408_s3 = inlined_call_operand.hbm [shape: bf16[128,896], index: 3, kind: input, shape index: {}]   ;;  %s2409_s4 = inlined_call_operand.vmem [shape: f32[1,896], index: 4, kind: input, shape index: {}]   ;;  %s2410_s5 = inlined_call_operand.vmem [shape: f32[256,896], index: 5, kind: output, shape index: {}]  }
   0x1 LB: > { %s174_s21 = sshll.u32 %s2408_s3, 4  ;;  %s1384_s22 = sadd.s32 4294967295, %s1972_s18   ;;  %s1972_s18 = sphi %s2007_s18, %s16_s18   ;;  %s175_s21 = int_to_ptr.hbm [resolvable:$true] %s174_s21 }
   0x2   : > { %p1386_p0 = scmp.ge.s32.totalorder %s1972_s18, 1  ;;  %p157_p1 = scmp.lt.s32.totalorder %s1972_s18, 3 }
   0x3   : > { %p1694_p2 = scmp.eq.s32.totalorder %s1384_s22, 0  ;;  %s1974_s23 = smov [#allocation2]  }
   0x4   : > { %p158_p3 = pnand %p1386_p0, %p157_p1  ;;  %s176_s24 = sshll.u32 %s1974_s23, 4  ;;  %s177_s24 = int_to_ptr.vmem [resolvable:$true] %s176_s24 }
   0x5   : > { %s1975_s25 = smov 448   ;;  %s1976_s26 = smov 28  }
   0x6   : > { %p1690_p4 = pneg %p158_p3  ;;  %204 = sbr.rel (%p158_p3) target bundleno = 552 (0x228), region = 40 }
   0x8   : > { %p1691_p5 = pnand %p1694_p2, %p1690_p4 }
   0xa   : > { %1693 = dma.hbm_to_vmem [thread:$0]  (!%p1691_p5), %s175_s21, 7168, %s177_s24, [#allocation3], %s1975_s25, %s1975_s25, %s1976_s26  }
   0xb   : > { %1967 = dma.done.wait (%p1694_p2), [#allocation3], 7168  }
   0xc   : > { %1969 = vsyncadd (%p1694_p2), [#allocation3], 4294960128  ;;  %s1391_s27 = sshll.u32 %s1384_s22, 4  ;;  %vm302_vm0 = vcmask 1043456   ;;  %v272_v0 = vld [vmem:[%s2406_s1] sm:$0xf] }
   0xd   : > { %p235_p6 = scmp.lt.s32.totalorder %s1391_s27, 31  ;;  %v304_v3 = vsel %vm302_vm0, %v272_v0, 0  ;;  %vm277_vm1 = vcmask 64512   ;;  %v1601_v17 = vld [vmem:[#allocation2 + $0x188] sm:$0xf] }
   0xe   : > { %313 = vmatpush.bf16.msra.mxu0 %v304_v3  ;;  %v1681_v18 = vld [vmem:[#allocation2 + $0x1a0] sm:$0xf0]  ;;  %v1678_v19 = vld [vmem:[#allocation2 + $0x18c] sm:$0xf]  ;;  %v1603_v21 = vld [vmem:[#allocation2 + $0x1a4] sm:$0xf0] }
   0xf   : > { %s2412_s27 = smov (!%p235_p6, %s1391_s27), 31  ;;  %v1602_v20 = vor.u32 %v1681_v18, %v1601_v17  ;;  %v1609_v22 = vld [vmem:[#allocation2 + $0x190] sm:$0xf]  ;;  %v1682_v23 = vld [vmem:[#allocation2 + $0x1a8] sm:$0xf0]  ;;  %v1606_v24 = vor.u32 %v1678_v19, %v1603_v21 }
  0x10   : > { %s1392_s28 = sshll.u32 %s2412_s27, 3  ;;  %v1610_v25 = vor.u32 %v1682_v23, %v1609_v22  ;;  %v1679_v26 = vld [vmem:[#allocation2 + $0x194] sm:$0xf]  ;;  %v1611_v27 = vld [vmem:[#allocation2 + $0x1ac] sm:$0xf0]  ;;  %s1685_s13 = smul.u32 56, %s2412_s27 }
  0x11   : > { %s2024_s6 = scalar_lea.vmem %s2405_s0, %s1392_s28  ;;  %747 = vmatpush.bf16.msra.mxu1 %v1602_v20  ;;  %v1614_v28 = vor.u32 %v1679_v26, %v1611_v27  ;;  %796 = vmatpush.bf16.msra.mxu2 %v1606_v24  ;;  %v1573_v32 = vld [vmem:[#allocation2 + $0x150] sm:$0xf]  ;;  %v1674_v33 = vld [vmem:[#allocation2 + $0x168] sm:$0xf0]  ;;  %v1671_v34 = vld [vmem:[#allocation2 + $0x154] sm:$0xf] }
  0x12   : > { %v248_v1 = vld [vmem:[%s2024_s6] sm:$0xff]  ;;  %v249_v2 = vld [vmem:[%s2024_s6 + $0x8] sm:$0xff]  ;;  %v250_v5 = vld [vmem:[%s2024_s6 + $0x10] sm:$0xff]  ;;  %845 = vmatpush.bf16.msra.mxu3 %v1610_v25  ;;  %v1574_v35 = vor.u32 %v1674_v33, %v1573_v32  ;;  %s2148_s16 = scalar_lea.vmem %s2410_s5, %s1685_s13 }
  0x13   : > { %v264_v4 = vpack.c.bf16 %v249_v2, %v248_v1  ;;  %v251_v6 = vld [vmem:[%s2024_s6 + $0x18] sm:$0xff]  ;;  %v252_v8 = vld [vmem:[%s2024_s6 + $0x20] sm:$0xff]  ;;  %v253_v9 = vld [vmem:[%s2024_s6 + $0x28] sm:$0xff]  ;;  %894 = vmatpush.bf16.msrb.mxu0 %v1614_v28 }
  0x14   : > { %v265_v7 = vpack.c.bf16 %v251_v6, %v250_v5  ;;  %v266_v10 = vpack.c.bf16 %v253_v9, %v252_v8  ;;  %v254_v11 = vld [vmem:[%s2024_s6 + $0x30] sm:$0xff]  ;;  %v255_v12 = vld [vmem:[%s2024_s6 + $0x38] sm:$0xff]  ;;  %v256_v14 = vld [vmem:[%s2024_s6 + $0x40] sm:$0xff] }
  0x15   : > { %1395 = vmatmul.msk.bf16.vlgmr.msra.gmra.mxu0 %vm277_vm1, %v264_v4  ;;  %v267_v13 = vpack.c.bf16 %v255_v12, %v254_v11  ;;  %v257_v15 = vld [vmem:[%s2024_s6 + $0x48] sm:$0xff]  ;;  %v258_v29 = vld [vmem:[%s2024_s6 + $0x50] sm:$0xff]  ;;  %v259_v30 = vld [vmem:[%s2024_s6 + $0x58] sm:$0xff]  ;;  %748 = vmatpush.bf16.msra.mxu1 %v1574_v35 }
  0x16   : > { %v268_v16 = vpack.c.bf16 %v257_v15, %v256_v14  ;;  %v269_v31 = vpack.c.bf16 %v259_v30, %v258_v29  ;;  %v1575_v36 = vld [vmem:[#allocation2 + $0x16c] sm:$0xf0]  ;;  %v1581_v37 = vld [vmem:[#allocation2 + $0x158] sm:$0xf]  ;;  %v1675_v38 = vld [vmem:[#allocation2 + $0x170] sm:$0xf0] }
  0x17   : > { %v1578_v39 = vor.u32 %v1671_v34, %v1575_v36  ;;  %v1582_v40 = vor.u32 %v1675_v38, %v1581_v37  ;;  %v1672_v41 = vld [vmem:[#allocation2 + $0x15c] sm:$0xf]  ;;  %v1583_v42 = vld [vmem:[#allocation2 + $0x174] sm:$0xf0]  ;;  %v1667_v45 = vld [vmem:[#allocation2 + $0x130] sm:$0xf0] }
  0x18   : > { %v1545_v43 = vld [vmem:[#allocation2 + $0x118] sm:$0xf]  ;;  %v1586_v44 = vor.u32 %v1672_v41, %v1583_v42  ;;  %v1664_v46 = vld [vmem:[#allocation2 + $0x11c] sm:$0xf]  ;;  %v1553_v50 = vld [vmem:[#allocation2 + $0x120] sm:$0xf] }
  0x19   : > { %v1547_v47 = vld [vmem:[#allocation2 + $0x134] sm:$0xf0]  ;;  %797 = vmatpush.bf16.msra.mxu2 %v1578_v39  ;;  %846 = vmatpush.bf16.msra.mxu3 %v1582_v40  ;;  %v1546_v48 = vor.u32 %v1667_v45, %v1545_v43  ;;  %v1668_v51 = vld [vmem:[#allocation2 + $0x138] sm:$0xf0]  ;;  %v1665_v52 = vld [vmem:[#allocation2 + $0x124] sm:$0xf] }
  0x1a   : > { %v1550_v49 = vor.u32 %v1664_v46, %v1547_v47  ;;  %895 = vmatpush.bf16.msrb.mxu0 %v1586_v44  ;;  %v1554_v53 = vor.u32 %v1668_v51, %v1553_v50  ;;  %v1555_v54 = vld [vmem:[#allocation2 + $0x13c] sm:$0xf0]  ;;  %v1660_v56 = vld [vmem:[#allocation2 + $0xf8] sm:$0xf0]  ;;  %v1657_v58 = vld [vmem:[#allocation2 + $0xe4] sm:$0xf] }
  0x1b   : > { %v1517_v55 = vld [vmem:[#allocation2 + $0xe0] sm:$0xf]  ;;  %v1558_v57 = vor.u32 %v1665_v52, %v1555_v54  ;;  %v1525_v60 = vld [vmem:[#allocation2 + $0xe8] sm:$0xf]  ;;  %749 = vmatpush.bf16.msra.mxu1 %v1546_v48  ;;  %v1661_v62 = vld [vmem:[#allocation2 + $0x100] sm:$0xf0] }
  0x1c   : > { %v1519_v59 = vld [vmem:[#allocation2 + $0xfc] sm:$0xf0]  ;;  %v1518_v61 = vor.u32 %v1660_v56, %v1517_v55  ;;  %v1658_v63 = vld [vmem:[#allocation2 + $0xec] sm:$0xf]  ;;  %v1527_v0 = vld [vmem:[#allocation2 + $0x104] sm:$0xf0]  ;;  %v1526_v2 = vor.u32 %v1661_v62, %v1525_v60 }
  0x1d   : > { %798 = vmatpush.bf16.msra.mxu2 %v1550_v49  ;;  %847 = vmatpush.bf16.msra.mxu3 %v1554_v53  ;;  %v1522_v1 = vor.u32 %v1657_v58, %v1519_v59  ;;  %v1530_v3 = vor.u32 %v1658_v63, %v1527_v0  ;;  %v260_v4 = vld [vmem:[%s2024_s6 + $0x60] sm:$0xff]  ;;  %v261_v5 = vld [vmem:[%s2024_s6 + $0x68] sm:$0xff]  ;;  %v1497_v11 = vld [vmem:[#allocation2 + $0xb0] sm:$0xf] }
  0x1e   : > { %896 = vmatpush.bf16.msrb.mxu0 %v1558_v57  ;;  %v1489_v6 = vld [vmem:[#allocation2 + $0xa8] sm:$0xf]  ;;  %v1650_v8 = vld [vmem:[#allocation2 + $0xac] sm:$0xf]  ;;  %v1499_v17 = vld [vmem:[#allocation2 + $0xcc] sm:$0xf0] }
  0x1f   : > { %750 = vmatpush.bf16.msra.mxu1 %v1518_v61  ;;  %v1654_v12 = vld [vmem:[#allocation2 + $0xc8] sm:$0xf0]  ;;  %v1461_v19 = vld [vmem:[#allocation2 + $0x70] sm:$0xf]  ;;  %v1643_v21 = vld [vmem:[#allocation2 + $0x74] sm:$0xf] }
  0x20   : > { %v1498_v15 = vor.u32 %v1654_v12, %v1497_v11  ;;  %v1646_v20 = vld [vmem:[#allocation2 + $0x88] sm:$0xf0]  ;;  %v1463_v23 = vld [vmem:[#allocation2 + $0x8c] sm:$0xf0]  ;;  %v1469_v24 = vld [vmem:[#allocation2 + $0x78] sm:$0xf] }
  0x21   : > { %799 = vmatpush.bf16.msra.mxu2 %v1522_v1  ;;  %848 = vmatpush.bf16.msra.mxu3 %v1526_v2  ;;  %v1462_v22 = vor.u32 %v1646_v20, %v1461_v19  ;;  %v1647_v25 = vld [vmem:[#allocation2 + $0x90] sm:$0xf0]  ;;  %v1466_v26 = vor.u32 %v1643_v21, %v1463_v23  ;;  %v1644_v28 = vld [vmem:[#allocation2 + $0x7c] sm:$0xf]  ;;  %v1471_v29 = vld [vmem:[#allocation2 + $0x94] sm:$0xf0] }
  0x22   : > { %897 = vmatpush.bf16.msrb.mxu0 %v1530_v3  ;;  %v1470_v27 = vor.u32 %v1647_v25, %v1469_v24  ;;  %v1474_v30 = vor.u32 %v1644_v28, %v1471_v29  ;;  %v1639_v32 = vld [vmem:[#allocation2 + $0x50] sm:$0xf0]  ;;  %v1636_v33 = vld [vmem:[#allocation2 + $0x3c] sm:$0xf]  ;;  %v1435_v35 = vld [vmem:[#allocation2 + $0x54] sm:$0xf0] }
  0x23   : > { %v1441_v36 = vld [vmem:[#allocation2 + $0x40] sm:$0xf]  ;;  %v1640_v37 = vld [vmem:[#allocation2 + $0x58] sm:$0xf0]  ;;  %v1438_v38 = vor.u32 %v1636_v33, %v1435_v35  ;;  %v1637_v40 = vld [vmem:[#allocation2 + $0x44] sm:$0xf] }
  0x24   : > { %v1442_v39 = vor.u32 %v1640_v37, %v1441_v36  ;;  %v1443_v41 = vld [vmem:[#allocation2 + $0x5c] sm:$0xf0]  ;;  %v1632_v44 = vld [vmem:[#allocation2 + $0x18] sm:$0xf0]  ;;  %v1629_v45 = vld [vmem:[#allocation2 + $0x4] sm:$0xf] }
  0x25   : > { %1396 = vmatmul.msk.bf16.gmra.mxu0 %vm277_vm1, %v265_v7  ;;  %v1653_v7 = vld [vmem:[#allocation2 + $0xc0] sm:$0xf0]  ;;  %849 = vmatpush.bf16.msra.mxu3 %v1498_v15  ;;  %v1446_v42 = vor.u32 %v1637_v40, %v1443_v41  ;;  %v1405_v43 = vld [vmem:[#allocation2] sm:$0xf]  ;;  %v1413_v48 = vld [vmem:[#allocation2 + $0x8] sm:$0xf] }
  0x26   : > { %v1490_v9 = vor.u32 %v1653_v7, %v1489_v6  ;;  %v1406_v46 = vor.u32 %v1632_v44, %v1405_v43  ;;  %v1407_v47 = vld [vmem:[#allocation2 + $0x1c] sm:$0xf0]  ;;  %v1633_v49 = vld [vmem:[#allocation2 + $0x20] sm:$0xf0]  ;;  %v1630_v52 = vld [vmem:[#allocation2 + $0xc] sm:$0xf] }
  0x27   : > { %v1410_v50 = vor.u32 %v1629_v45, %v1407_v47  ;;  %v1414_v51 = vor.u32 %v1633_v49, %v1413_v48  ;;  %v1415_v53 = vld [vmem:[#allocation2 + $0x24] sm:$0xf0]  ;;  %v262_v54 = vld [vmem:[%s2024_s6 + $0x70] sm:$0xff]  ;;  %v263_v55 = vld [vmem:[%s2024_s6 + $0x78] sm:$0xff] }
  0x28   : > { %751 = vmatpush.bf16.msra.mxu1 %v1490_v9  ;;  %v1418_v56 = vor.u32 %v1630_v52, %v1415_v53  ;;  %v271_v57 = vpack.c.bf16 %v263_v55, %v262_v54  ;;  %v1680_v58 = vld [vmem:[#allocation2 + $0x19c] sm:$0xf]  ;;  %v1619_v59 = vld [vmem:[#allocation2 + $0x1b4] sm:$0xf0]  ;;  %v1625_v60 = vld [vmem:[#allocation2 + $0x1a0] sm:$0xf] }
  0x29   : > { %850 = vmatpush.bf16.msra.mxu3 %v1470_v27  ;;  %v1622_v61 = vor.u32 %v1680_v58, %v1619_v59  ;;  %v1684_v62 = vld [vmem:[#allocation2 + $0x1b8] sm:$0xf0]  ;;  %v1617_v0 = vld [vmem:[#allocation2 + $0x198] sm:$0xf]  ;;  %v1683_v1 = vld [vmem:[#allocation2 + $0x1b0] sm:$0xf0] }
  0x2a   : > { %v1626_v63 = vor.u32 %v1684_v62, %v1625_v60  ;;  %v1618_v2 = vor.u32 %v1683_v1, %v1617_v0  ;;  %v1597_v6 = vld [vmem:[#allocation2 + $0x168] sm:$0xf]  ;;  %v1589_v11 = vld [vmem:[#allocation2 + $0x160] sm:$0xf]  ;;  %v1676_v12 = vld [vmem:[#allocation2 + $0x178] sm:$0xf0] }
  0x2b   : > { %v1666_v21 = vld [vmem:[#allocation2 + $0x12c] sm:$0xf]  ;;  %v1569_v23 = vld [vmem:[#allocation2 + $0x130] sm:$0xf]  ;;  %v1561_v27 = vld [vmem:[#allocation2 + $0x128] sm:$0xf] }
  0x2c   : > { %752 = vmatpush.bf16.msra.mxu1 %v1462_v22  ;;  %v1563_v22 = vld [vmem:[#allocation2 + $0x144] sm:$0xf0]  ;;  %v1670_v25 = vld [vmem:[#allocation2 + $0x148] sm:$0xf0]  ;;  %v1669_v28 = vld [vmem:[#allocation2 + $0x140] sm:$0xf0] }
  0x2d   : > { %851 = vmatpush.bf16.msra.mxu3 %v1442_v39  ;;  %v1566_v24 = vor.u32 %v1666_v21, %v1563_v22  ;;  %v1562_v29 = vor.u32 %v1669_v28, %v1561_v27  ;;  %v1659_v37 = vld [vmem:[#allocation2 + $0xf4] sm:$0xf]  ;;  %v1541_v39 = vld [vmem:[#allocation2 + $0xf8] sm:$0xf]  ;;  %v1533_v43 = vld [vmem:[#allocation2 + $0xf0] sm:$0xf] }
  0x2e   : > { %v1663_v41 = vld [vmem:[#allocation2 + $0x110] sm:$0xf0]  ;;  %v1662_v44 = vld [vmem:[#allocation2 + $0x108] sm:$0xf0]  ;;  %v1652_v53 = vld [vmem:[#allocation2 + $0xbc] sm:$0xf] }
  0x2f   : > { %v1534_v45 = vor.u32 %v1662_v44, %v1533_v43  ;;  %v1507_v54 = vld [vmem:[#allocation2 + $0xd4] sm:$0xf0]  ;;  %v1513_v55 = vld [vmem:[#allocation2 + $0xc0] sm:$0xf]  ;;  %v1655_v60 = vld [vmem:[#allocation2 + $0xd0] sm:$0xf0] }
  0x30   : > { %v1505_v59 = vld [vmem:[#allocation2 + $0xb8] sm:$0xf]  ;;  %v1642_v27 = vld [vmem:[#allocation2 + $0x68] sm:$0xf0]  ;;  %v1635_v44 = vld [vmem:[#allocation2 + $0x30] sm:$0xf0] }
  0x31   : > { %852 = vmatpush.bf16.msra.mxu3 %v1414_v51 }
  0x35   : > { %1397 = vmatmul.msk.bf16.gmra.mxu0 %vm277_vm1, %v266_v10  ;;  %v1491_v10 = vld [vmem:[#allocation2 + $0xc4] sm:$0xf0]  ;;  %1041 = vmatpush.bf16.msrb.mxu3 %v1626_v63 }
  0x36   : > { %v1494_v14 = vor.u32 %v1650_v8, %v1491_v10  ;;  %v1677_v8 = vld [vmem:[#allocation2 + $0x180] sm:$0xf0]  ;;  %v2056_v10 = vld [vmem:[%s2407_s2] ss:$0 sm:$0xff] }
  0x37   : > { %v1598_v9 = vor.u32 %v1677_v8, %v1597_v6  ;;  %v1479_v6 = vld [vmem:[#allocation2 + $0x9c] sm:$0xf0] }
  0x38   : > { %800 = vmatpush.bf16.msra.mxu2 %v1494_v14 }
  0x39   : > { %1042 = vmatpush.bf16.msrb.mxu3 %v1598_v9  ;;  %v1649_v9 = vld [vmem:[#allocation2 + $0xa0] sm:$0xf0] }
  0x3c   : > { %801 = vmatpush.bf16.msra.mxu2 %v1466_v26  ;;  %v1570_v26 = vor.u32 %v1670_v25, %v1569_v23  ;;  %v1638_v23 = vld [vmem:[#allocation2 + $0x4c] sm:$0xf]  ;;  %v1457_v25 = vld [vmem:[#allocation2 + $0x50] sm:$0xf] }
  0x3d   : > { %v1458_v28 = vor.u32 %v1642_v27, %v1457_v25 }
  0x3e   : > { %1043 = vmatpush.bf16.msrb.mxu3 %v1570_v26 }
  0x40   : > { %802 = vmatpush.bf16.msra.mxu2 %v1438_v38  ;;  %v1535_v38 = vld [vmem:[#allocation2 + $0x10c] sm:$0xf0] }
  0x41   : > { %v1538_v40 = vor.u32 %v1659_v37, %v1535_v38 }
  0x44   : > { %803 = vmatpush.bf16.msra.mxu2 %v1410_v50 }
  0x45   : > { %1398 = vmatmul.msk.bf16.gmra.mxu0 %vm277_vm1, %v267_v13  ;;  %v270_v13 = vpack.c.bf16 %v261_v5, %v260_v4  ;;  %v1673_v4 = vld [vmem:[#allocation2 + $0x164] sm:$0xf]  ;;  %v1591_v5 = vld [vmem:[#allocation2 + $0x17c] sm:$0xf0] }
  0x46   : > { %v1594_v7 = vor.u32 %v1673_v4, %v1591_v5  ;;  %v1645_v5 = vld [vmem:[#allocation2 + $0x84] sm:$0xf] }
  0x47   : > { %v1482_v8 = vor.u32 %v1645_v5, %v1479_v6 }
  0x48   : > { %992 = vmatpush.bf16.msrb.mxu2 %v1622_v61  ;;  %v1506_v61 = vor.u32 %v1655_v60, %v1505_v59 }
  0x4c   : > { %993 = vmatpush.bf16.msrb.mxu2 %v1594_v7  ;;  %v1485_v7 = vld [vmem:[#allocation2 + $0x88] sm:$0xf] }
  0x50   : > { %994 = vmatpush.bf16.msrb.mxu2 %v1566_v24  ;;  %v1451_v24 = vld [vmem:[#allocation2 + $0x64] sm:$0xf0] }
  0x51   : > { %v1454_v26 = vor.u32 %v1638_v23, %v1451_v24 }
  0x54   : > { %995 = vmatpush.bf16.msrb.mxu2 %v1538_v40  ;;  %v1631_v40 = vld [vmem:[#allocation2 + $0x14] sm:$0xf] }
  0x55   : > { %1399 = vmatmul.msk.bf16.gmra.mxu0 %vm277_vm1, %v268_v16  ;;  %v1651_v16 = vld [vmem:[#allocation2 + $0xb4] sm:$0xf] }
  0x56   : > { %v1502_v18 = vor.u32 %v1651_v16, %v1499_v17 }
  0x58   : > { %898 = vmatpush.bf16.msrb.mxu0 %v1502_v18 }
  0x5c   : > { %899 = vmatpush.bf16.msrb.mxu0 %v1474_v30 }
  0x60   : > { %900 = vmatpush.bf16.msrb.mxu0 %v1446_v42  ;;  %v1542_v42 = vor.u32 %v1663_v41, %v1541_v39  ;;  %v1423_v41 = vld [vmem:[#allocation2 + $0x2c] sm:$0xf0] }
  0x61   : > { %v1426_v43 = vor.u32 %v1631_v40, %v1423_v41 }
  0x62   : > { %1044 = vmatpush.bf16.msrb.mxu3 %v1542_v42  ;;  %v1429_v42 = vld [vmem:[#allocation2 + $0x18] sm:$0xf] }
  0x64   : > { %901 = vmatpush.bf16.msrb.mxu0 %v1418_v56  ;;  %v1510_v56 = vor.u32 %v1652_v53, %v1507_v54 }
  0x65   : > { %1400 = vmatmul.msk.bf16.gmra.mxu0 %vm277_vm1, %v269_v31  ;;  %v1433_v31 = vld [vmem:[#allocation2 + $0x38] sm:$0xf] }
  0x66   : > { %v1434_v34 = vor.u32 %v1639_v32, %v1433_v31  ;;  %996 = vmatpush.bf16.msrb.mxu2 %v1510_v56 }
  0x68   : > { %753 = vmatpush.bf16.msra.mxu1 %v1434_v34 }
  0x6a   : > { %997 = vmatpush.bf16.msrb.mxu2 %v1482_v8 }
  0x6c   : > { %754 = vmatpush.bf16.msra.mxu1 %v1406_v46 }
  0x6e   : > { %998 = vmatpush.bf16.msrb.mxu2 %v1454_v26 }
  0x70   : > { %943 = vmatpush.bf16.msrb.mxu1 %v1618_v2 }
  0x72   : > { %999 = vmatpush.bf16.msrb.mxu2 %v1426_v43 }
  0x75   : > { %1401 = vmatmul.msk.bf16.gmra.mxu0 %vm277_vm1, %v270_v13  ;;  %v1590_v13 = vor.u32 %v1676_v12, %v1589_v11  ;;  %v1486_v11 = vor.u32 %v1649_v9, %v1485_v7  ;;  %v1477_v12 = vld [vmem:[#allocation2 + $0x80] sm:$0xf] }
  0x77   : > { %944 = vmatpush.bf16.msrb.mxu1 %v1590_v13  ;;  %v1648_v13 = vld [vmem:[#allocation2 + $0x98] sm:$0xf0] }
  0x7b   : > { %945 = vmatpush.bf16.msrb.mxu1 %v1562_v29  ;;  %v1449_v29 = vld [vmem:[#allocation2 + $0x48] sm:$0xf] }
  0x7f   : > { %946 = vmatpush.bf16.msrb.mxu1 %v1534_v45  ;;  %v1421_v45 = vld [vmem:[#allocation2 + $0x10] sm:$0xf] }
  0x83   : > { %947 = vmatpush.bf16.msrb.mxu1 %v1506_v61 }
  0x85   : > { %1402 = vmatmul.msk.bf16.gmra.mxu0 %vm277_vm1, %v271_v57  ;;  %v1656_v57 = vld [vmem:[#allocation2 + $0xd8] sm:$0xf0] }
  0x86   : > { %v1514_v58 = vor.u32 %v1656_v57, %v1513_v55 }
  0x88   : > { %1045 = vmatpush.bf16.msrb.mxu3 %v1514_v58 }
  0x8c   : > { %1046 = vmatpush.bf16.msrb.mxu3 %v1486_v11 }
  0x90   : > { %1047 = vmatpush.bf16.msrb.mxu3 %v1458_v28 }
  0x92   : > { %v315_v3 = vpop.f32.mrf.mxu0 }
  0x93   : > { %v316_v14 = vadd.f32 %v2056_v10, %v315_v3 }
  0x95   : > { %v355_v17 = vmax.f32 %v316_v14, 0.0  ;;  %v1478_v14 = vor.u32 %v1648_v13, %v1477_v12 }
  0x97   : > { %948 = vmatpush.bf16.msrb.mxu1 %v1478_v14 }
  0x9a   : > { %v317_v15 = vpop.f32.mrf.mxu0 }
  0x9b   : > { %v318_v16 = vadd.f32 %v2056_v10, %v317_v15 }
  0x9d   : > { %v356_v18 = vmax.f32 %v318_v16, 0.0 }
  0x9f   : > { %v2060_v19 = vpack.c.bf16 %v356_v18, %v355_v17 }
  0xa1   : > { %755 = vmatmul.bf16.vlgmr.msra.gmra.mxu1 %v2060_v19  ;;  %804 = vmatmul.bf16.vlgmr.msra.gmra.mxu2 %v2060_v19 }
  0xa2   : > { %853 = vmatmul.bf16.vlgmr.msra.gmra.mxu3 %v2060_v19  ;;  %902 = vmatmul.bf16.vlgmr.msrb.gmra.mxu0 %v2060_v19  ;;  %v320_v20 = vpop.f32.mrf.mxu0 }
  0xa3   : > { %v321_v30 = vadd.f32 %v2056_v10, %v320_v20 }
  0xa5   : > { %v357_v33 = vmax.f32 %v321_v30, 0.0  ;;  %v1641_v30 = vld [vmem:[#allocation2 + $0x60] sm:$0xf0] }
  0xaa   : > { %v322_v31 = vpop.f32.mrf.mxu0 }
  0xab   : > { %v323_v32 = vadd.f32 %v2056_v10, %v322_v31  ;;  %v1450_v31 = vor.u32 %v1641_v30, %v1449_v29 }
  0xad   : > { %v358_v34 = vmax.f32 %v323_v32, 0.0  ;;  %949 = vmatpush.bf16.msrb.mxu1 %v1450_v31 }
  0xaf   : > { %v2068_v35 = vpack.c.bf16 %v358_v34, %v357_v33 }
  0xb1   : > { %760 = vmatmul.bf16.gmra.mxu1 %v2068_v35  ;;  %809 = vmatmul.bf16.gmra.mxu2 %v2068_v35 }
  0xb2   : > { %858 = vmatmul.bf16.gmra.mxu3 %v2068_v35  ;;  %907 = vmatmul.bf16.gmra.mxu0 %v2068_v35  ;;  %v325_v36 = vpop.f32.mrf.mxu0 }
  0xb3   : > { %v326_v46 = vadd.f32 %v2056_v10, %v325_v36 }
  0xb5   : > { %v359_v49 = vmax.f32 %v326_v46, 0.0  ;;  %v1634_v46 = vld [vmem:[#allocation2 + $0x28] sm:$0xf0] }
  0xba   : > { %v327_v47 = vpop.f32.mrf.mxu0 }
  0xbb   : > { %v328_v48 = vadd.f32 %v2056_v10, %v327_v47  ;;  %v1430_v47 = vor.u32 %v1635_v44, %v1429_v42 }
  0xbd   : > { %v360_v50 = vmax.f32 %v328_v48, 0.0  ;;  %v1422_v48 = vor.u32 %v1634_v46, %v1421_v45  ;;  %1048 = vmatpush.bf16.msrb.mxu3 %v1430_v47 }
  0xbf   : > { %v2076_v51 = vpack.c.bf16 %v360_v50, %v359_v49  ;;  %950 = vmatpush.bf16.msrb.mxu1 %v1422_v48 }
  0xc1   : > { %765 = vmatmul.bf16.gmra.mxu1 %v2076_v51  ;;  %814 = vmatmul.bf16.gmra.mxu2 %v2076_v51 }
  0xc2   : > { %863 = vmatmul.bf16.gmra.mxu3 %v2076_v51  ;;  %912 = vmatmul.bf16.gmra.mxu0 %v2076_v51  ;;  %v330_v52 = vpop.f32.mrf.mxu0 }
  0xc3   : > { %v331_v62 = vadd.f32 %v2056_v10, %v330_v52 }
  0xc5   : > { %v361_v1 = vmax.f32 %v331_v62, 0.0 }
  0xca   : > { %v332_v63 = vpop.f32.mrf.mxu0 }
  0xcb   : > { %v333_v0 = vadd.f32 %v2056_v10, %v332_v63  ;;  %v2125_v63 = vld [vmem:[%s2409_s4] sm:$0xff] }
  0xcc   : > { %v2139_v6 = vperm.slane %v2125_v63, 1  ;;  %v2143_v7 = vperm.slane %v2125_v63, 2 }
  0xcd   : > { %v362_v2 = vmax.f32 %v333_v0, 0.0  ;;  %v2128_v0 = vperm.slane %v2125_v63, 0 }
  0xcf   : > { %v2084_v3 = vpack.c.bf16 %v362_v2, %v361_v1 }
  0xd1   : > { %770 = vmatmul.bf16.gmra.mxu1 %v2084_v3  ;;  %819 = vmatmul.bf16.gmra.mxu2 %v2084_v3 }
  0xd2   : > { %868 = vmatmul.bf16.gmra.mxu3 %v2084_v3  ;;  %917 = vmatmul.bf16.gmra.mxu0 %v2084_v3  ;;  %v335_v4 = vpop.f32.mrf.mxu0 }
  0xd3   : > { %v336_v15 = vadd.f32 %v2056_v10, %v335_v4 }
  0xd5   : > { %v363_v18 = vmax.f32 %v336_v15, 0.0 }
  0xda   : > { %v337_v16 = vpop.f32.mrf.mxu0 }
  0xdb   : > { %v338_v17 = vadd.f32 %v2056_v10, %v337_v16 }
  0xdd   : > { %v364_v20 = vmax.f32 %v338_v17, 0.0 }
  0xdf   : > { %v2092_v21 = vpack.c.bf16 %v364_v20, %v363_v18 }
  0xe1   : > { %775 = vmatmul.bf16.gmra.mxu1 %v2092_v21  ;;  %824 = vmatmul.bf16.gmra.mxu2 %v2092_v21 }
  0xe2   : > { %873 = vmatmul.bf16.gmra.mxu3 %v2092_v21  ;;  %922 = vmatmul.bf16.gmra.mxu0 %v2092_v21  ;;  %v340_v22 = vpop.f32.mrf.mxu0 }
  0xe3   : > { %v341_v32 = vadd.f32 %v2056_v10, %v340_v22 }
  0xe5   : > { %v365_v36 = vmax.f32 %v341_v32, 0.0 }
  0xea   : > { %v342_v33 = vpop.f32.mrf.mxu0 }
  0xeb   : > { %v343_v34 = vadd.f32 %v2056_v10, %v342_v33 }
  0xed   : > { %v366_v37 = vmax.f32 %v343_v34, 0.0 }
  0xef   : > { %v2100_v38 = vpack.c.bf16 %v366_v37, %v365_v36 }
  0xf1   : > { %780 = vmatmul.bf16.gmra.mxu1 %v2100_v38  ;;  %829 = vmatmul.bf16.gmra.mxu2 %v2100_v38 }
  0xf2   : > { %878 = vmatmul.bf16.gmra.mxu3 %v2100_v38  ;;  %927 = vmatmul.bf16.gmra.mxu0 %v2100_v38  ;;  %v345_v39 = vpop.f32.mrf.mxu0 }
  0xf3   : > { %v346_v49 = vadd.f32 %v2056_v10, %v345_v39 }
  0xf5   : > { %v367_v53 = vmax.f32 %v346_v49, 0.0 }
  0xfa   : > { %v347_v50 = vpop.f32.mrf.mxu0 }
  0xfb   : > { %v348_v52 = vadd.f32 %v2056_v10, %v347_v50 }
  0xfd   : > { %v368_v54 = vmax.f32 %v348_v52, 0.0 }
  0xff   : > { %v2108_v55 = vpack.c.bf16 %v368_v54, %v367_v53 }
 0x101   : > { %785 = vmatmul.bf16.gmra.mxu1 %v2108_v55  ;;  %834 = vmatmul.bf16.gmra.mxu2 %v2108_v55 }
 0x102   : > { %883 = vmatmul.bf16.gmra.mxu3 %v2108_v55  ;;  %932 = vmatmul.bf16.gmra.mxu0 %v2108_v55  ;;  %v350_v56 = vpop.f32.mrf.mxu0 }
 0x103   : > { %v351_v57 = vadd.f32 %v2056_v10, %v350_v56 }
 0x105   : > { %v369_v60 = vmax.f32 %v351_v57, 0.0 }
 0x10a   : > { %v352_v58 = vpop.f32.mrf.mxu0 }
 0x10b   : > { %v353_v59 = vadd.f32 %v2056_v10, %v352_v58  ;;  %v2131_v10 = vperm.slane %v2125_v63, 3 }
 0x10d   : > { %v370_v61 = vmax.f32 %v353_v59, 0.0 }
 0x10f   : > { %v2116_v62 = vpack.c.bf16 %v370_v61, %v369_v60 }
 0x111   : > { %790 = vmatmul.bf16.gmra.mxu1 %v2116_v62  ;;  %839 = vmatmul.bf16.gmra.mxu2 %v2116_v62 }
 0x112   : > { %888 = vmatmul.bf16.gmra.mxu3 %v2116_v62  ;;  %937 = vmatmul.bf16.gmra.mxu0 %v2116_v62 }
 0x11e   : > { %v756_v1 = vpop.f32.mrf.mxu1 }
 0x11f   : > { %v757_v2 = vadd.f32 %v756_v1, %v2128_v0  ;;  %v903_v4 = vpop.f32.mrf.mxu0 }
 0x120   : > { %v904_v5 = vadd.f32 %v903_v4, %v2131_v10 }
 0x121   : > { %1708 = vtanh.f32 %v757_v2  ;;  %951 = vmatmul.bf16.vlgmr.msrb.gmra.mxu1 %v2060_v19  ;;  %1000 = vmatmul.bf16.vlgmr.msrb.gmra.mxu2 %v2060_v19 }
 0x122   : > { %1710 = vtanh.f32 %v904_v5  ;;  %1049 = vmatmul.bf16.vlgmr.msrb.gmra.mxu3 %v2060_v19 }
 0x124   : > { %v805_v8 = vpop.f32.mrf.mxu2 }
 0x125   : > { %v806_v9 = vadd.f32 %v805_v8, %v2139_v6  ;;  %v854_v11 = vpop.f32.mrf.mxu3 }
 0x126   : > { %v855_v12 = vadd.f32 %v854_v11, %v2143_v7  ;;  %v758_v13 = vpop.f32.mrf.mxu1 }
 0x127   : > { %v1709_v14 = vpop.eup %1708  ;;  %1712 = vtanh.f32 %v806_v9  ;;  %v759_v19 = vadd.f32 %v758_v13, %v2128_v0  ;;  %v905_v15 = vpop.f32.mrf.mxu0 }
 0x128   : > { %v1711_v16 = vpop.eup %1710  ;;  %1202 = vst [vmem:[%s2148_s16] sm:$0xff] %v1709_v14  ;;  %1714 = vtanh.f32 %v855_v12  ;;  %v906_v17 = vadd.f32 %v905_v15, %v2131_v10 }
 0x129   : > { %1205 = vst [vmem:[%s2148_s16 + $0x18] sm:$0xff] %v1711_v16  ;;  %1716 = vtanh.f32 %v759_v19 }
 0x12a   : > { %1718 = vtanh.f32 %v906_v17 }
 0x12c   : > { %v807_v18 = vpop.f32.mrf.mxu2 }
 0x12d   : > { %v1713_v20 = vpop.eup %1712  ;;  %v808_v22 = vadd.f32 %v807_v18, %v2139_v6  ;;  %v856_v23 = vpop.f32.mrf.mxu3 }
 0x12e   : > { %v1715_v24 = vpop.eup %1714  ;;  %1203 = vst [vmem:[%s2148_s16 + $0x8] sm:$0xff] %v1713_v20  ;;  %v857_v25 = vadd.f32 %v856_v23, %v2143_v7  ;;  %v761_v26 = vpop.f32.mrf.mxu1 }
 0x12f   : > { %v1717_v27 = vpop.eup %1716  ;;  %1204 = vst [vmem:[%s2148_s16 + $0x10] sm:$0xff] %v1715_v24  ;;  %1720 = vtanh.f32 %v808_v22  ;;  %v762_v28 = vadd.f32 %v761_v26, %v2128_v0  ;;  %v908_v29 = vpop.f32.mrf.mxu0 }
 0x130   : > { %v1719_v30 = vpop.eup %1718  ;;  %1209 = vst [vmem:[%s2148_s16 + $0x38] sm:$0xff] %v1717_v27  ;;  %1722 = vtanh.f32 %v857_v25  ;;  %v909_v31 = vadd.f32 %v908_v29, %v2131_v10 }
 0x131   : > { %1212 = vst [vmem:[%s2148_s16 + $0x50] sm:$0xff] %v1719_v30  ;;  %1724 = vtanh.f32 %v762_v28  ;;  %956 = vmatmul.bf16.gmra.mxu1 %v2068_v35  ;;  %1005 = vmatmul.bf16.gmra.mxu2 %v2068_v35 }
 0x132   : > { %1726 = vtanh.f32 %v909_v31  ;;  %1054 = vmatmul.bf16.gmra.mxu3 %v2068_v35 }
 0x134   : > { %v810_v32 = vpop.f32.mrf.mxu2 }
 0x135   : > { %v1721_v33 = vpop.eup %1720  ;;  %v811_v34 = vadd.f32 %v810_v32, %v2139_v6  ;;  %v859_v36 = vpop.f32.mrf.mxu3 }
 0x136   : > { %v1723_v37 = vpop.eup %1722  ;;  %1210 = vst [vmem:[%s2148_s16 + $0x40] sm:$0xff] %v1721_v33  ;;  %v860_v39 = vadd.f32 %v859_v36, %v2143_v7  ;;  %v763_v40 = vpop.f32.mrf.mxu1 }
 0x137   : > { %v1725_v41 = vpop.eup %1724  ;;  %1211 = vst [vmem:[%s2148_s16 + $0x48] sm:$0xff] %v1723_v37  ;;  %1728 = vtanh.f32 %v811_v34  ;;  %v764_v42 = vadd.f32 %v763_v40, %v2128_v0  ;;  %v910_v43 = vpop.f32.mrf.mxu0 }
 0x138   : > { %v1727_v44 = vpop.eup %1726  ;;  %1216 = vst [vmem:[%s2148_s16 + $0x70] sm:$0xff] %v1725_v41  ;;  %1730 = vtanh.f32 %v860_v39  ;;  %v911_v35 = vadd.f32 %v910_v43, %v2131_v10 }
 0x139   : > { %1219 = vst [vmem:[%s2148_s16 + $0x88] sm:$0xff] %v1727_v44  ;;  %1732 = vtanh.f32 %v764_v42 }
 0x13a   : > { %1734 = vtanh.f32 %v911_v35 }
 0x13c   : > { %v812_v45 = vpop.f32.mrf.mxu2 }
 0x13d   : > { %v1729_v46 = vpop.eup %1728  ;;  %v813_v47 = vadd.f32 %v812_v45, %v2139_v6  ;;  %v861_v48 = vpop.f32.mrf.mxu3 }
 0x13e   : > { %v1731_v49 = vpop.eup %1730  ;;  %1217 = vst [vmem:[%s2148_s16 + $0x78] sm:$0xff] %v1729_v46  ;;  %v862_v50 = vadd.f32 %v861_v48, %v2143_v7  ;;  %v766_v52 = vpop.f32.mrf.mxu1 }
 0x13f   : > { %v1733_v53 = vpop.eup %1732  ;;  %1218 = vst [vmem:[%s2148_s16 + $0x80] sm:$0xff] %v1731_v49  ;;  %1736 = vtanh.f32 %v813_v47  ;;  %v767_v54 = vadd.f32 %v766_v52, %v2128_v0  ;;  %v913_v56 = vpop.f32.mrf.mxu0 }
 0x140   : > { %v1735_v57 = vpop.eup %1734  ;;  %1223 = vst [vmem:[%s2148_s16 + $0xa8] sm:$0xff] %v1733_v53  ;;  %1738 = vtanh.f32 %v862_v50  ;;  %v914_v58 = vadd.f32 %v913_v56, %v2131_v10 }
 0x141   : > { %1226 = vst [vmem:[%s2148_s16 + $0xc0] sm:$0xff] %v1735_v57  ;;  %1740 = vtanh.f32 %v767_v54  ;;  %961 = vmatmul.bf16.gmra.mxu1 %v2076_v51  ;;  %1010 = vmatmul.bf16.gmra.mxu2 %v2076_v51 }
 0x142   : > { %1742 = vtanh.f32 %v914_v58  ;;  %1059 = vmatmul.bf16.gmra.mxu3 %v2076_v51 }
 0x144   : > { %v815_v59 = vpop.f32.mrf.mxu2 }
 0x145   : > { %v1737_v60 = vpop.eup %1736  ;;  %v816_v61 = vadd.f32 %v815_v59, %v2139_v6  ;;  %v864_v1 = vpop.f32.mrf.mxu3 }
 0x146   : > { %v1739_v2 = vpop.eup %1738  ;;  %1224 = vst [vmem:[%s2148_s16 + $0xb0] sm:$0xff] %v1737_v60  ;;  %v865_v4 = vadd.f32 %v864_v1, %v2143_v7  ;;  %v768_v5 = vpop.f32.mrf.mxu1 }
 0x147   : > { %v1741_v8 = vpop.eup %1740  ;;  %1225 = vst [vmem:[%s2148_s16 + $0xb8] sm:$0xff] %v1739_v2  ;;  %1744 = vtanh.f32 %v816_v61  ;;  %v769_v9 = vadd.f32 %v768_v5, %v2128_v0  ;;  %v915_v11 = vpop.f32.mrf.mxu0 }
 0x148   : > { %v1743_v12 = vpop.eup %1742  ;;  %1230 = vst [vmem:[%s2148_s16 + $0xe0] sm:$0xff] %v1741_v8  ;;  %1746 = vtanh.f32 %v865_v4  ;;  %v916_v51 = vadd.f32 %v915_v11, %v2131_v10 }
 0x149   : > { %1233 = vst [vmem:[%s2148_s16 + $0xf8] sm:$0xff] %v1743_v12  ;;  %1748 = vtanh.f32 %v769_v9 }
 0x14a   : > { %1750 = vtanh.f32 %v916_v51 }
 0x14c   : > { %v817_v13 = vpop.f32.mrf.mxu2 }
 0x14d   : > { %v1745_v14 = vpop.eup %1744  ;;  %v818_v19 = vadd.f32 %v817_v13, %v2139_v6  ;;  %v866_v15 = vpop.f32.mrf.mxu3 }
 0x14e   : > { %v1747_v16 = vpop.eup %1746  ;;  %1231 = vst [vmem:[%s2148_s16 + $0xe8] sm:$0xff] %v1745_v14  ;;  %v867_v17 = vadd.f32 %v866_v15, %v2143_v7  ;;  %v771_v18 = vpop.f32.mrf.mxu1 }
 0x14f   : > { %v1749_v20 = vpop.eup %1748  ;;  %1232 = vst [vmem:[%s2148_s16 + $0xf0] sm:$0xff] %v1747_v16  ;;  %1752 = vtanh.f32 %v818_v19  ;;  %v772_v22 = vadd.f32 %v771_v18, %v2128_v0  ;;  %v918_v23 = vpop.f32.mrf.mxu0 }
 0x150   : > { %v1751_v24 = vpop.eup %1750  ;;  %1237 = vst [vmem:[%s2148_s16 + $0x118] sm:$0xff] %v1749_v20  ;;  %1754 = vtanh.f32 %v867_v17  ;;  %v919_v25 = vadd.f32 %v918_v23, %v2131_v10 }
 0x151   : > { %1240 = vst [vmem:[%s2148_s16 + $0x130] sm:$0xff] %v1751_v24  ;;  %1756 = vtanh.f32 %v772_v22  ;;  %966 = vmatmul.bf16.gmra.mxu1 %v2084_v3  ;;  %1015 = vmatmul.bf16.gmra.mxu2 %v2084_v3 }
 0x152   : > { %1758 = vtanh.f32 %v919_v25  ;;  %1064 = vmatmul.bf16.gmra.mxu3 %v2084_v3 }
 0x154   : > { %v820_v26 = vpop.f32.mrf.mxu2 }
 0x155   : > { %v1753_v27 = vpop.eup %1752  ;;  %v821_v28 = vadd.f32 %v820_v26, %v2139_v6  ;;  %v869_v29 = vpop.f32.mrf.mxu3 }
 0x156   : > { %v1755_v30 = vpop.eup %1754  ;;  %1238 = vst [vmem:[%s2148_s16 + $0x120] sm:$0xff] %v1753_v27  ;;  %v870_v31 = vadd.f32 %v869_v29, %v2143_v7  ;;  %v773_v32 = vpop.f32.mrf.mxu1 }
 0x157   : > { %v1757_v33 = vpop.eup %1756  ;;  %1239 = vst [vmem:[%s2148_s16 + $0x128] sm:$0xff] %v1755_v30  ;;  %1760 = vtanh.f32 %v821_v28  ;;  %v774_v34 = vadd.f32 %v773_v32, %v2128_v0  ;;  %v920_v36 = vpop.f32.mrf.mxu0 }
 0x158   : > { %v1759_v37 = vpop.eup %1758  ;;  %1244 = vst [vmem:[%s2148_s16 + $0x150] sm:$0xff] %v1757_v33  ;;  %1762 = vtanh.f32 %v870_v31  ;;  %v921_v3 = vadd.f32 %v920_v36, %v2131_v10 }
 0x159   : > { %1247 = vst [vmem:[%s2148_s16 + $0x168] sm:$0xff] %v1759_v37  ;;  %1764 = vtanh.f32 %v774_v34 }
 0x15a   : > { %1766 = vtanh.f32 %v921_v3 }
 0x15c   : > { %v822_v39 = vpop.f32.mrf.mxu2 }
 0x15d   : > { %v1761_v40 = vpop.eup %1760  ;;  %v823_v41 = vadd.f32 %v822_v39, %v2139_v6  ;;  %v871_v42 = vpop.f32.mrf.mxu3 }
 0x15e   : > { %v1763_v43 = vpop.eup %1762  ;;  %1245 = vst [vmem:[%s2148_s16 + $0x158] sm:$0xff] %v1761_v40  ;;  %v872_v44 = vadd.f32 %v871_v42, %v2143_v7  ;;  %v776_v35 = vpop.f32.mrf.mxu1 }
 0x15f   : > { %v1765_v45 = vpop.eup %1764  ;;  %1246 = vst [vmem:[%s2148_s16 + $0x160] sm:$0xff] %v1763_v43  ;;  %1768 = vtanh.f32 %v823_v41  ;;  %v777_v46 = vadd.f32 %v776_v35, %v2128_v0  ;;  %v923_v47 = vpop.f32.mrf.mxu0 }
 0x160   : > { %v1767_v48 = vpop.eup %1766  ;;  %1251 = vst [vmem:[%s2148_s16 + $0x188] sm:$0xff] %v1765_v45  ;;  %1770 = vtanh.f32 %v872_v44  ;;  %v924_v49 = vadd.f32 %v923_v47, %v2131_v10 }
 0x161   : > { %1254 = vst [vmem:[%s2148_s16 + $0x1a0] sm:$0xff] %v1767_v48  ;;  %1772 = vtanh.f32 %v777_v46  ;;  %971 = vmatmul.bf16.gmra.mxu1 %v2092_v21  ;;  %1020 = vmatmul.bf16.gmra.mxu2 %v2092_v21 }
 0x162   : > { %1774 = vtanh.f32 %v924_v49  ;;  %1069 = vmatmul.bf16.gmra.mxu3 %v2092_v21 }
 0x164   : > { %v825_v50 = vpop.f32.mrf.mxu2 }
 0x165   : > { %v1769_v52 = vpop.eup %1768  ;;  %v826_v53 = vadd.f32 %v825_v50, %v2139_v6  ;;  %v874_v54 = vpop.f32.mrf.mxu3 }
 0x166   : > { %v1771_v56 = vpop.eup %1770  ;;  %1252 = vst [vmem:[%s2148_s16 + $0x190] sm:$0xff] %v1769_v52  ;;  %v875_v57 = vadd.f32 %v874_v54, %v2143_v7  ;;  %v778_v58 = vpop.f32.mrf.mxu1 }
 0x167   : > { %v1773_v59 = vpop.eup %1772  ;;  %1253 = vst [vmem:[%s2148_s16 + $0x198] sm:$0xff] %v1771_v56  ;;  %1776 = vtanh.f32 %v826_v53  ;;  %v779_v60 = vadd.f32 %v778_v58, %v2128_v0  ;;  %v925_v61 = vpop.f32.mrf.mxu0 }
 0x168   : > { %v1775_v1 = vpop.eup %1774  ;;  %1258 = vst [vmem:[%s2148_s16 + $0x1c0] sm:$0xff] %v1773_v59  ;;  %1778 = vtanh.f32 %v875_v57  ;;  %v926_v21 = vadd.f32 %v925_v61, %v2131_v10 }
 0x169   : > { %1261 = vst [vmem:[%s2148_s16 + $0x1d8] sm:$0xff] %v1775_v1  ;;  %1780 = vtanh.f32 %v779_v60 }
 0x16a   : > { %1782 = vtanh.f32 %v926_v21 }
 0x16c   : > { %v827_v2 = vpop.f32.mrf.mxu2 }
 0x16d   : > { %v1777_v4 = vpop.eup %1776  ;;  %v828_v5 = vadd.f32 %v827_v2, %v2139_v6  ;;  %v876_v8 = vpop.f32.mrf.mxu3 }
 0x16e   : > { %v1779_v9 = vpop.eup %1778  ;;  %1259 = vst [vmem:[%s2148_s16 + $0x1c8] sm:$0xff] %v1777_v4  ;;  %v877_v11 = vadd.f32 %v876_v8, %v2143_v7  ;;  %v781_v12 = vpop.f32.mrf.mxu1 }
 0x16f   : > { %v1781_v51 = vpop.eup %1780  ;;  %1260 = vst [vmem:[%s2148_s16 + $0x1d0] sm:$0xff] %v1779_v9  ;;  %1784 = vtanh.f32 %v828_v5  ;;  %v782_v13 = vadd.f32 %v781_v12, %v2128_v0  ;;  %v928_v14 = vpop.f32.mrf.mxu0 }
 0x170   : > { %v1783_v19 = vpop.eup %1782  ;;  %1265 = vst [vmem:[%s2148_s16 + $0x1f8] sm:$0xff] %v1781_v51  ;;  %1786 = vtanh.f32 %v877_v11  ;;  %v929_v15 = vadd.f32 %v928_v14, %v2131_v10 }
 0x171   : > { %1268 = vst [vmem:[%s2148_s16 + $0x210] sm:$0xff] %v1783_v19  ;;  %1788 = vtanh.f32 %v782_v13  ;;  %976 = vmatmul.bf16.gmra.mxu1 %v2100_v38  ;;  %1025 = vmatmul.bf16.gmra.mxu2 %v2100_v38 }
 0x172   : > { %1790 = vtanh.f32 %v929_v15  ;;  %1074 = vmatmul.bf16.gmra.mxu3 %v2100_v38 }
 0x174   : > { %v830_v16 = vpop.f32.mrf.mxu2 }
 0x175   : > { %v1785_v17 = vpop.eup %1784  ;;  %v831_v18 = vadd.f32 %v830_v16, %v2139_v6  ;;  %v879_v20 = vpop.f32.mrf.mxu3 }
 0x176   : > { %v1787_v22 = vpop.eup %1786  ;;  %1266 = vst [vmem:[%s2148_s16 + $0x200] sm:$0xff] %v1785_v17  ;;  %v880_v23 = vadd.f32 %v879_v20, %v2143_v7  ;;  %v783_v24 = vpop.f32.mrf.mxu1  ;;  %v2290_v17 = vperm.slane %v2125_v63, 4 }
 0x177   : > { %v1789_v25 = vpop.eup %1788  ;;  %1267 = vst [vmem:[%s2148_s16 + $0x208] sm:$0xff] %v1787_v22  ;;  %1792 = vtanh.f32 %v831_v18  ;;  %v784_v26 = vadd.f32 %v783_v24, %v2128_v0  ;;  %v930_v27 = vpop.f32.mrf.mxu0 }
 0x178   : > { %v1791_v28 = vpop.eup %1790  ;;  %1272 = vst [vmem:[%s2148_s16 + $0x230] sm:$0xff] %v1789_v25  ;;  %1794 = vtanh.f32 %v880_v23  ;;  %v931_v38 = vadd.f32 %v930_v27, %v2131_v10 }
 0x179   : > { %1275 = vst [vmem:[%s2148_s16 + $0x248] sm:$0xff] %v1791_v28  ;;  %1796 = vtanh.f32 %v784_v26  ;;  %v2303_v28 = vperm.slane %v2125_v63, 6 }
 0x17a   : > { %1798 = vtanh.f32 %v931_v38 }
 0x17c   : > { %v832_v29 = vpop.f32.mrf.mxu2 }
 0x17d   : > { %v1793_v30 = vpop.eup %1792  ;;  %v833_v31 = vadd.f32 %v832_v29, %v2139_v6  ;;  %v881_v32 = vpop.f32.mrf.mxu3 }
 0x17e   : > { %v1795_v33 = vpop.eup %1794  ;;  %1273 = vst [vmem:[%s2148_s16 + $0x238] sm:$0xff] %v1793_v30  ;;  %v882_v34 = vadd.f32 %v881_v32, %v2143_v7  ;;  %v786_v36 = vpop.f32.mrf.mxu1 }
 0x17f   : > { %v1797_v37 = vpop.eup %1796  ;;  %1274 = vst [vmem:[%s2148_s16 + $0x240] sm:$0xff] %v1795_v33  ;;  %1800 = vtanh.f32 %v833_v31  ;;  %v787_v3 = vadd.f32 %v786_v36, %v2128_v0  ;;  %v933_v39 = vpop.f32.mrf.mxu0 }
 0x180   : > { %v1799_v40 = vpop.eup %1798  ;;  %1279 = vst [vmem:[%s2148_s16 + $0x268] sm:$0xff] %v1797_v37  ;;  %1802 = vtanh.f32 %v882_v34  ;;  %v934_v41 = vadd.f32 %v933_v39, %v2131_v10 }
 0x181   : > { %1282 = vst [vmem:[%s2148_s16 + $0x280] sm:$0xff] %v1799_v40  ;;  %1804 = vtanh.f32 %v787_v3  ;;  %981 = vmatmul.bf16.gmra.mxu1 %v2108_v55  ;;  %1030 = vmatmul.bf16.gmra.mxu2 %v2108_v55 }
 0x182   : > { %1806 = vtanh.f32 %v934_v41  ;;  %1079 = vmatmul.bf16.gmra.mxu3 %v2108_v55 }
 0x184   : > { %v835_v42 = vpop.f32.mrf.mxu2 }
 0x185   : > { %v1801_v43 = vpop.eup %1800  ;;  %v836_v44 = vadd.f32 %v835_v42, %v2139_v6  ;;  %v884_v35 = vpop.f32.mrf.mxu3 }
 0x186   : > { %v1803_v45 = vpop.eup %1802  ;;  %1280 = vst [vmem:[%s2148_s16 + $0x270] sm:$0xff] %v1801_v43  ;;  %v885_v46 = vadd.f32 %v884_v35, %v2143_v7  ;;  %v788_v47 = vpop.f32.mrf.mxu1 }
 0x187   : > { %v1805_v48 = vpop.eup %1804  ;;  %1281 = vst [vmem:[%s2148_s16 + $0x278] sm:$0xff] %v1803_v45  ;;  %1808 = vtanh.f32 %v836_v44  ;;  %v789_v49 = vadd.f32 %v788_v47, %v2128_v0  ;;  %v935_v50 = vpop.f32.mrf.mxu0 }
 0x188   : > { %v1807_v52 = vpop.eup %1806  ;;  %1286 = vst [vmem:[%s2148_s16 + $0x2a0] sm:$0xff] %v1805_v48  ;;  %1810 = vtanh.f32 %v885_v46  ;;  %v936_v55 = vadd.f32 %v935_v50, %v2131_v10 }
 0x189   : > { %1289 = vst [vmem:[%s2148_s16 + $0x2b8] sm:$0xff] %v1807_v52  ;;  %1812 = vtanh.f32 %v789_v49 }
 0x18a   : > { %1814 = vtanh.f32 %v936_v55 }
 0x18c   : > { %v837_v53 = vpop.f32.mrf.mxu2 }
 0x18d   : > { %v1809_v54 = vpop.eup %1808  ;;  %v838_v56 = vadd.f32 %v837_v53, %v2139_v6  ;;  %v886_v57 = vpop.f32.mrf.mxu3 }
 0x18e   : > { %v1811_v58 = vpop.eup %1810  ;;  %1287 = vst [vmem:[%s2148_s16 + $0x2a8] sm:$0xff] %v1809_v54  ;;  %v887_v59 = vadd.f32 %v886_v57, %v2143_v7  ;;  %v791_v60 = vpop.f32.mrf.mxu1 }
 0x18f   : > { %v1813_v61 = vpop.eup %1812  ;;  %1288 = vst [vmem:[%s2148_s16 + $0x2b0] sm:$0xff] %v1811_v58  ;;  %1816 = vtanh.f32 %v838_v56  ;;  %v792_v1 = vadd.f32 %v791_v60, %v2128_v0  ;;  %v938_v21 = vpop.f32.mrf.mxu0 }
 0x190   : > { %v1815_v2 = vpop.eup %1814  ;;  %1293 = vst [vmem:[%s2148_s16 + $0x2d8] sm:$0xff] %v1813_v61  ;;  %1818 = vtanh.f32 %v887_v59  ;;  %v939_v4 = vadd.f32 %v938_v21, %v2131_v10 }
 0x191   : > { %1296 = vst [vmem:[%s2148_s16 + $0x2f0] sm:$0xff] %v1815_v2  ;;  %1820 = vtanh.f32 %v792_v1  ;;  %986 = vmatmul.bf16.gmra.mxu1 %v2116_v62  ;;  %1035 = vmatmul.bf16.gmra.mxu2 %v2116_v62 }
 0x192   : > { %1822 = vtanh.f32 %v939_v4  ;;  %1084 = vmatmul.bf16.gmra.mxu3 %v2116_v62 }
 0x194   : > { %v840_v5 = vpop.f32.mrf.mxu2 }
 0x195   : > { %v1817_v8 = vpop.eup %1816  ;;  %v841_v9 = vadd.f32 %v840_v5, %v2139_v6  ;;  %v889_v11 = vpop.f32.mrf.mxu3 }
 0x196   : > { %v1819_v12 = vpop.eup %1818  ;;  %1294 = vst [vmem:[%s2148_s16 + $0x2e0] sm:$0xff] %v1817_v8  ;;  %v890_v51 = vadd.f32 %v889_v11, %v2143_v7  ;;  %v793_v13 = vpop.f32.mrf.mxu1 }
 0x197   : > { %v1821_v14 = vpop.eup %1820  ;;  %1295 = vst [vmem:[%s2148_s16 + $0x2e8] sm:$0xff] %v1819_v12  ;;  %1824 = vtanh.f32 %v841_v9  ;;  %v794_v19 = vadd.f32 %v793_v13, %v2128_v0  ;;  %v940_v15 = vpop.f32.mrf.mxu0 }
 0x198   : > { %v1823_v16 = vpop.eup %1822  ;;  %1300 = vst [vmem:[%s2148_s16 + $0x310] sm:$0xff] %v1821_v14  ;;  %1826 = vtanh.f32 %v890_v51  ;;  %v941_v62 = vadd.f32 %v940_v15, %v2131_v10 }
 0x199   : > { %1303 = vst [vmem:[%s2148_s16 + $0x328] sm:$0xff] %v1823_v16  ;;  %1828 = vtanh.f32 %v794_v19 }
 0x19a   : > { %1830 = vtanh.f32 %v941_v62 }
 0x19c   : > { %v842_v18 = vpop.f32.mrf.mxu2 }
 0x19d   : > { %v1825_v20 = vpop.eup %1824  ;;  %v843_v22 = vadd.f32 %v842_v18, %v2139_v6  ;;  %v891_v0 = vpop.f32.mrf.mxu3  ;;  %v2300_v6 = vperm.slane %v2125_v63, 5 }
 0x19e   : > { %v1827_v23 = vpop.eup %1826  ;;  %1301 = vst [vmem:[%s2148_s16 + $0x318] sm:$0xff] %v1825_v20  ;;  %v892_v24 = vadd.f32 %v891_v0, %v2143_v7  ;;  %v952_v25 = vpop.f32.mrf.mxu1 }
 0x19f   : > { %v1829_v26 = vpop.eup %1828  ;;  %1302 = vst [vmem:[%s2148_s16 + $0x320] sm:$0xff] %v1827_v23  ;;  %1832 = vtanh.f32 %v843_v22  ;;  %v953_v10 = vadd.f32 %v952_v25, %v2290_v17 }
 0x1a0   : > { %v1831_v27 = vpop.eup %1830  ;;  %1307 = vst [vmem:[%s2148_s16 + $0x348] sm:$0xff] %v1829_v26  ;;  %1834 = vtanh.f32 %v892_v24 }
 0x1a1   : > { %1310 = vst [vmem:[%s2148_s16 + $0x360] sm:$0xff] %v1831_v27  ;;  %1836 = vtanh.f32 %v953_v10 }
 0x1a4   : > { %v1001_v7 = vpop.f32.mrf.mxu2 }
 0x1a5   : > { %v1833_v38 = vpop.eup %1832  ;;  %v1002_v29 = vadd.f32 %v1001_v7, %v2300_v6  ;;  %v1050_v30 = vpop.f32.mrf.mxu3 }
 0x1a6   : > { %v1835_v31 = vpop.eup %1834  ;;  %1308 = vst [vmem:[%s2148_s16 + $0x350] sm:$0xff] %v1833_v38  ;;  %v1051_v32 = vadd.f32 %v1050_v30, %v2303_v28  ;;  %v954_v33 = vpop.f32.mrf.mxu1 }
 0x1a7   : > { %v1837_v34 = vpop.eup %1836  ;;  %1309 = vst [vmem:[%s2148_s16 + $0x358] sm:$0xff] %v1835_v31  ;;  %1838 = vtanh.f32 %v1002_v29  ;;  %v955_v36 = vadd.f32 %v954_v33, %v2290_v17 }
 0x1a8   : > { %1206 = vst [vmem:[%s2148_s16 + $0x20] sm:$0xff] %v1837_v34  ;;  %1840 = vtanh.f32 %v1051_v32 }
 0x1a9   : > { %1842 = vtanh.f32 %v955_v36 }
 0x1ac   : > { %v1003_v63 = vpop.f32.mrf.mxu2 }
 0x1ad   : > { %v1839_v37 = vpop.eup %1838  ;;  %v1004_v3 = vadd.f32 %v1003_v63, %v2300_v6  ;;  %v1052_v39 = vpop.f32.mrf.mxu3 }
 0x1ae   : > { %v1841_v40 = vpop.eup %1840  ;;  %1207 = vst [vmem:[%s2148_s16 + $0x28] sm:$0xff] %v1839_v37  ;;  %v1053_v41 = vadd.f32 %v1052_v39, %v2303_v28  ;;  %v957_v42 = vpop.f32.mrf.mxu1 }
 0x1af   : > { %v1843_v43 = vpop.eup %1842  ;;  %1208 = vst [vmem:[%s2148_s16 + $0x30] sm:$0xff] %v1841_v40  ;;  %1844 = vtanh.f32 %v1004_v3  ;;  %v958_v44 = vadd.f32 %v957_v42, %v2290_v17 }
 0x1b0   : > { %1213 = vst [vmem:[%s2148_s16 + $0x58] sm:$0xff] %v1843_v43  ;;  %1846 = vtanh.f32 %v1053_v41 }
 0x1b1   : > { %1848 = vtanh.f32 %v958_v44 }
 0x1b4   : > { %v1006_v35 = vpop.f32.mrf.mxu2 }
 0x1b5   : > { %v1845_v45 = vpop.eup %1844  ;;  %v1007_v46 = vadd.f32 %v1006_v35, %v2300_v6  ;;  %v1055_v47 = vpop.f32.mrf.mxu3 }
 0x1b6   : > { %v1847_v48 = vpop.eup %1846  ;;  %1214 = vst [vmem:[%s2148_s16 + $0x60] sm:$0xff] %v1845_v45  ;;  %v1056_v49 = vadd.f32 %v1055_v47, %v2303_v28  ;;  %v959_v50 = vpop.f32.mrf.mxu1 }
 0x1b7   : > { %v1849_v52 = vpop.eup %1848  ;;  %1215 = vst [vmem:[%s2148_s16 + $0x68] sm:$0xff] %v1847_v48  ;;  %1850 = vtanh.f32 %v1007_v46  ;;  %v960_v55 = vadd.f32 %v959_v50, %v2290_v17 }
 0x1b8   : > { %1220 = vst [vmem:[%s2148_s16 + $0x90] sm:$0xff] %v1849_v52  ;;  %1852 = vtanh.f32 %v1056_v49 }
 0x1b9   : > { %1854 = vtanh.f32 %v960_v55 }
 0x1bc   : > { %v1008_v53 = vpop.f32.mrf.mxu2 }
 0x1bd   : > { %v1851_v54 = vpop.eup %1850  ;;  %v1009_v56 = vadd.f32 %v1008_v53, %v2300_v6  ;;  %v1057_v57 = vpop.f32.mrf.mxu3 }
 0x1be   : > { %v1853_v58 = vpop.eup %1852  ;;  %1221 = vst [vmem:[%s2148_s16 + $0x98] sm:$0xff] %v1851_v54  ;;  %v1058_v59 = vadd.f32 %v1057_v57, %v2303_v28  ;;  %v962_v60 = vpop.f32.mrf.mxu1 }
 0x1bf   : > { %v1855_v61 = vpop.eup %1854  ;;  %1222 = vst [vmem:[%s2148_s16 + $0xa0] sm:$0xff] %v1853_v58  ;;  %1856 = vtanh.f32 %v1009_v56  ;;  %v963_v1 = vadd.f32 %v962_v60, %v2290_v17 }
 0x1c0   : > { %1227 = vst [vmem:[%s2148_s16 + $0xc8] sm:$0xff] %v1855_v61  ;;  %1858 = vtanh.f32 %v1058_v59 }
 0x1c1   : > { %1860 = vtanh.f32 %v963_v1 }
 0x1c4   : > { %v1011_v21 = vpop.f32.mrf.mxu2 }
 0x1c5   : > { %v1857_v2 = vpop.eup %1856  ;;  %v1012_v4 = vadd.f32 %v1011_v21, %v2300_v6  ;;  %v1060_v5 = vpop.f32.mrf.mxu3 }
 0x1c6   : > { %v1859_v8 = vpop.eup %1858  ;;  %1228 = vst [vmem:[%s2148_s16 + $0xd0] sm:$0xff] %v1857_v2  ;;  %v1061_v9 = vadd.f32 %v1060_v5, %v2303_v28  ;;  %v964_v11 = vpop.f32.mrf.mxu1 }
 0x1c7   : > { %v1861_v12 = vpop.eup %1860  ;;  %1229 = vst [vmem:[%s2148_s16 + $0xd8] sm:$0xff] %v1859_v8  ;;  %1862 = vtanh.f32 %v1012_v4  ;;  %v965_v51 = vadd.f32 %v964_v11, %v2290_v17 }
 0x1c8   : > { %1234 = vst [vmem:[%s2148_s16 + $0x100] sm:$0xff] %v1861_v12  ;;  %1864 = vtanh.f32 %v1061_v9 }
 0x1c9   : > { %1866 = vtanh.f32 %v965_v51 }
 0x1cc   : > { %v1013_v13 = vpop.f32.mrf.mxu2 }
 0x1cd   : > { %v1863_v14 = vpop.eup %1862  ;;  %v1014_v19 = vadd.f32 %v1013_v13, %v2300_v6  ;;  %v1062_v15 = vpop.f32.mrf.mxu3 }
 0x1ce   : > { %v1865_v16 = vpop.eup %1864  ;;  %1235 = vst [vmem:[%s2148_s16 + $0x108] sm:$0xff] %v1863_v14  ;;  %v1063_v62 = vadd.f32 %v1062_v15, %v2303_v28  ;;  %v967_v18 = vpop.f32.mrf.mxu1 }
 0x1cf   : > { %v1867_v20 = vpop.eup %1866  ;;  %1236 = vst [vmem:[%s2148_s16 + $0x110] sm:$0xff] %v1865_v16  ;;  %1868 = vtanh.f32 %v1014_v19  ;;  %v968_v22 = vadd.f32 %v967_v18, %v2290_v17 }
 0x1d0   : > { %1241 = vst [vmem:[%s2148_s16 + $0x138] sm:$0xff] %v1867_v20  ;;  %1870 = vtanh.f32 %v1063_v62 }
 0x1d1   : > { %1872 = vtanh.f32 %v968_v22 }
 0x1d4   : > { %v1016_v0 = vpop.f32.mrf.mxu2 }
 0x1d5   : > { %v1869_v23 = vpop.eup %1868  ;;  %v1017_v24 = vadd.f32 %v1016_v0, %v2300_v6  ;;  %v1065_v25 = vpop.f32.mrf.mxu3 }
 0x1d6   : > { %v1871_v26 = vpop.eup %1870  ;;  %1242 = vst [vmem:[%s2148_s16 + $0x140] sm:$0xff] %v1869_v23  ;;  %v1066_v10 = vadd.f32 %v1065_v25, %v2303_v28  ;;  %v969_v27 = vpop.f32.mrf.mxu1 }
 0x1d7   : > { %v1873_v7 = vpop.eup %1872  ;;  %1243 = vst [vmem:[%s2148_s16 + $0x148] sm:$0xff] %v1871_v26  ;;  %1874 = vtanh.f32 %v1017_v24  ;;  %v970_v38 = vadd.f32 %v969_v27, %v2290_v17 }
 0x1d8   : > { %1248 = vst [vmem:[%s2148_s16 + $0x170] sm:$0xff] %v1873_v7  ;;  %1876 = vtanh.f32 %v1066_v10 }
 0x1d9   : > { %1878 = vtanh.f32 %v970_v38 }
 0x1dc   : > { %v1018_v29 = vpop.f32.mrf.mxu2 }
 0x1dd   : > { %v1875_v30 = vpop.eup %1874  ;;  %v1019_v31 = vadd.f32 %v1018_v29, %v2300_v6  ;;  %v1067_v32 = vpop.f32.mrf.mxu3 }
 0x1de   : > { %v1877_v33 = vpop.eup %1876  ;;  %1249 = vst [vmem:[%s2148_s16 + $0x178] sm:$0xff] %v1875_v30  ;;  %v1068_v34 = vadd.f32 %v1067_v32, %v2303_v28  ;;  %v972_v36 = vpop.f32.mrf.mxu1 }
 0x1df   : > { %v1879_v63 = vpop.eup %1878  ;;  %1250 = vst [vmem:[%s2148_s16 + $0x180] sm:$0xff] %v1877_v33  ;;  %1880 = vtanh.f32 %v1019_v31  ;;  %v973_v37 = vadd.f32 %v972_v36, %v2290_v17 }
 0x1e0   : > { %1255 = vst [vmem:[%s2148_s16 + $0x1a8] sm:$0xff] %v1879_v63  ;;  %1882 = vtanh.f32 %v1068_v34 }
 0x1e1   : > { %1884 = vtanh.f32 %v973_v37 }
 0x1e4   : > { %v1021_v3 = vpop.f32.mrf.mxu2 }
 0x1e5   : > { %v1881_v39 = vpop.eup %1880  ;;  %v1022_v40 = vadd.f32 %v1021_v3, %v2300_v6  ;;  %v1070_v41 = vpop.f32.mrf.mxu3 }
 0x1e6   : > { %v1883_v42 = vpop.eup %1882  ;;  %1256 = vst [vmem:[%s2148_s16 + $0x1b0] sm:$0xff] %v1881_v39  ;;  %v1071_v43 = vadd.f32 %v1070_v41, %v2303_v28  ;;  %v974_v44 = vpop.f32.mrf.mxu1 }
 0x1e7   : > { %v1885_v35 = vpop.eup %1884  ;;  %1257 = vst [vmem:[%s2148_s16 + $0x1b8] sm:$0xff] %v1883_v42  ;;  %1886 = vtanh.f32 %v1022_v40  ;;  %v975_v45 = vadd.f32 %v974_v44, %v2290_v17 }
 0x1e8   : > { %1262 = vst [vmem:[%s2148_s16 + $0x1e0] sm:$0xff] %v1885_v35  ;;  %1888 = vtanh.f32 %v1071_v43 }
 0x1e9   : > { %1890 = vtanh.f32 %v975_v45 }
 0x1ec   : > { %v1023_v46 = vpop.f32.mrf.mxu2 }
 0x1ed   : > { %v1887_v47 = vpop.eup %1886  ;;  %v1024_v48 = vadd.f32 %v1023_v46, %v2300_v6  ;;  %v1072_v49 = vpop.f32.mrf.mxu3 }
 0x1ee   : > { %v1889_v50 = vpop.eup %1888  ;;  %1263 = vst [vmem:[%s2148_s16 + $0x1e8] sm:$0xff] %v1887_v47  ;;  %v1073_v52 = vadd.f32 %v1072_v49, %v2303_v28  ;;  %v977_v55 = vpop.f32.mrf.mxu1 }
 0x1ef   : > { %v1891_v53 = vpop.eup %1890  ;;  %1264 = vst [vmem:[%s2148_s16 + $0x1f0] sm:$0xff] %v1889_v50  ;;  %1892 = vtanh.f32 %v1024_v48  ;;  %v978_v54 = vadd.f32 %v977_v55, %v2290_v17 }
 0x1f0   : > { %1269 = vst [vmem:[%s2148_s16 + $0x218] sm:$0xff] %v1891_v53  ;;  %1894 = vtanh.f32 %v1073_v52 }
 0x1f1   : > { %1896 = vtanh.f32 %v978_v54 }
 0x1f4   : > { %v1026_v56 = vpop.f32.mrf.mxu2 }
 0x1f5   : > { %v1893_v57 = vpop.eup %1892  ;;  %v1027_v58 = vadd.f32 %v1026_v56, %v2300_v6  ;;  %v1075_v59 = vpop.f32.mrf.mxu3 }
 0x1f6   : > { %v1895_v60 = vpop.eup %1894  ;;  %1270 = vst [vmem:[%s2148_s16 + $0x220] sm:$0xff] %v1893_v57  ;;  %v1076_v61 = vadd.f32 %v1075_v59, %v2303_v28  ;;  %v979_v1 = vpop.f32.mrf.mxu1 }
 0x1f7   : > { %v1897_v21 = vpop.eup %1896  ;;  %1271 = vst [vmem:[%s2148_s16 + $0x228] sm:$0xff] %v1895_v60  ;;  %1898 = vtanh.f32 %v1027_v58  ;;  %v980_v2 = vadd.f32 %v979_v1, %v2290_v17 }
 0x1f8   : > { %1276 = vst [vmem:[%s2148_s16 + $0x250] sm:$0xff] %v1897_v21  ;;  %1900 = vtanh.f32 %v1076_v61 }
 0x1f9   : > { %1902 = vtanh.f32 %v980_v2 }
 0x1fc   : > { %v1028_v4 = vpop.f32.mrf.mxu2 }
 0x1fd   : > { %v1899_v5 = vpop.eup %1898  ;;  %v1029_v8 = vadd.f32 %v1028_v4, %v2300_v6  ;;  %v1077_v9 = vpop.f32.mrf.mxu3 }
 0x1fe   : > { %v1901_v11 = vpop.eup %1900  ;;  %1277 = vst [vmem:[%s2148_s16 + $0x258] sm:$0xff] %v1899_v5  ;;  %v1078_v12 = vadd.f32 %v1077_v9, %v2303_v28  ;;  %v982_v51 = vpop.f32.mrf.mxu1 }
 0x1ff   : > { %v1903_v13 = vpop.eup %1902  ;;  %1278 = vst [vmem:[%s2148_s16 + $0x260] sm:$0xff] %v1901_v11  ;;  %1904 = vtanh.f32 %v1029_v8  ;;  %v983_v14 = vadd.f32 %v982_v51, %v2290_v17 }
 0x200   : > { %1283 = vst [vmem:[%s2148_s16 + $0x288] sm:$0xff] %v1903_v13  ;;  %1906 = vtanh.f32 %v1078_v12 }
 0x201   : > { %1908 = vtanh.f32 %v983_v14 }
 0x204   : > { %v1031_v19 = vpop.f32.mrf.mxu2 }
 0x205   : > { %v1905_v15 = vpop.eup %1904  ;;  %v1032_v16 = vadd.f32 %v1031_v19, %v2300_v6  ;;  %v1080_v62 = vpop.f32.mrf.mxu3 }
 0x206   : > { %v1907_v18 = vpop.eup %1906  ;;  %1284 = vst [vmem:[%s2148_s16 + $0x290] sm:$0xff] %v1905_v15  ;;  %v1081_v20 = vadd.f32 %v1080_v62, %v2303_v28  ;;  %v984_v22 = vpop.f32.mrf.mxu1 }
 0x207   : > { %v1909_v0 = vpop.eup %1908  ;;  %1285 = vst [vmem:[%s2148_s16 + $0x298] sm:$0xff] %v1907_v18  ;;  %1910 = vtanh.f32 %v1032_v16  ;;  %v985_v23 = vadd.f32 %v984_v22, %v2290_v17 }
 0x208   : > { %1290 = vst [vmem:[%s2148_s16 + $0x2c0] sm:$0xff] %v1909_v0  ;;  %1912 = vtanh.f32 %v1081_v20 }
 0x209   : > { %1914 = vtanh.f32 %v985_v23 }
 0x20c   : > { %v1033_v24 = vpop.f32.mrf.mxu2 }
 0x20d   : > { %v1911_v25 = vpop.eup %1910  ;;  %v1034_v26 = vadd.f32 %v1033_v24, %v2300_v6  ;;  %v1082_v10 = vpop.f32.mrf.mxu3 }
 0x20e   : > { %v1913_v27 = vpop.eup %1912  ;;  %1291 = vst [vmem:[%s2148_s16 + $0x2c8] sm:$0xff] %v1911_v25  ;;  %v1083_v7 = vadd.f32 %v1082_v10, %v2303_v28  ;;  %v987_v38 = vpop.f32.mrf.mxu1 }
 0x20f   : > { %v1915_v29 = vpop.eup %1914  ;;  %1292 = vst [vmem:[%s2148_s16 + $0x2d0] sm:$0xff] %v1913_v27  ;;  %1916 = vtanh.f32 %v1034_v26  ;;  %v988_v30 = vadd.f32 %v987_v38, %v2290_v17 }
 0x210   : > { %1297 = vst [vmem:[%s2148_s16 + $0x2f8] sm:$0xff] %v1915_v29  ;;  %1918 = vtanh.f32 %v1083_v7 }
 0x211   : > { %1920 = vtanh.f32 %v988_v30 }
 0x214   : > { %v1036_v31 = vpop.f32.mrf.mxu2 }
 0x215   : > { %v1917_v32 = vpop.eup %1916  ;;  %v1037_v33 = vadd.f32 %v1036_v31, %v2300_v6  ;;  %v1085_v34 = vpop.f32.mrf.mxu3 }
 0x216   : > { %v1919_v36 = vpop.eup %1918  ;;  %1298 = vst [vmem:[%s2148_s16 + $0x300] sm:$0xff] %v1917_v32  ;;  %v1086_v63 = vadd.f32 %v1085_v34, %v2303_v28  ;;  %v989_v37 = vpop.f32.mrf.mxu1 }
 0x217   : > { %v1921_v3 = vpop.eup %1920  ;;  %1299 = vst [vmem:[%s2148_s16 + $0x308] sm:$0xff] %v1919_v36  ;;  %1922 = vtanh.f32 %v1037_v33  ;;  %v990_v39 = vadd.f32 %v989_v37, %v2290_v17 }
 0x218   : > { %1304 = vst [vmem:[%s2148_s16 + $0x330] sm:$0xff] %v1921_v3  ;;  %1924 = vtanh.f32 %v1086_v63 }
 0x219   : > { %1926 = vtanh.f32 %v990_v39 }
 0x21c   : > { %v1038_v40 = vpop.f32.mrf.mxu2 }
 0x21d   : > { %v1923_v41 = vpop.eup %1922  ;;  %v1039_v42 = vadd.f32 %v1038_v40, %v2300_v6  ;;  %v1087_v43 = vpop.f32.mrf.mxu3 }
 0x21e   : > { %v1925_v44 = vpop.eup %1924  ;;  %1305 = vst [vmem:[%s2148_s16 + $0x338] sm:$0xff] %v1923_v41  ;;  %v1088_v35 = vadd.f32 %v1087_v43, %v2303_v28 }
 0x21f   : > { %v1927_v45 = vpop.eup %1926  ;;  %1306 = vst [vmem:[%s2148_s16 + $0x340] sm:$0xff] %v1925_v44  ;;  %1928 = vtanh.f32 %v1039_v42 }
 0x220   : > { %1311 = vst [vmem:[%s2148_s16 + $0x368] sm:$0xff] %v1927_v45  ;;  %1930 = vtanh.f32 %v1088_v35 }
 0x225   : > { %v1929_v17 = vpop.eup %1928 }
 0x226   : > { %v1931_v46 = vpop.eup %1930  ;;  %1312 = vst [vmem:[%s2148_s16 + $0x370] sm:$0xff] %v1929_v17 }
 0x227   : > { %1313 = vst [vmem:[%s2148_s16 + $0x378] sm:$0xff] %v1931_v46 }
 0x228 PF: > { %s16_s18 = sadd.s32 1, %s1972_s18  }
 0x229   : > { %p13_p7 = scmp.ge.s32.totalorder %s16_s18, 4  }
 0x22b   :  { %15 = sbr.rel (!%p13_p7) target bundleno = 1 (0x1), region = 75 }
 0x230   :  { %1338 = vsyncpa [#allocation3], 1 }
 0x231   :  { %1340 = vsyncpa [#allocation3 + $0x1], 1 }

</bundles_post_ra>
